<compile_context>
chip_gen: v7x
topology: tpu7x:2x2x1
jax: 0.10.0
libtpu: 0.0.40
codegen_flags: <defaults>
</compile_context>

<pallas_src>
import jax
import jax.numpy as jnp
from jax.experimental import pallas as pl
from jax.experimental.pallas import tpu as pltpu

NUM_DEVICES = 3
ACTION_SIZE = 3 ** NUM_DEVICES   # 27
STATE_SIZE = NUM_DEVICES * 4     # 12

H1 = 128
H2 = 64
LANE = 128                       # padded feature width for h2 / output

MAX_TILE_ROWS = 4096             # keeps double-buffered tiles < v5e's 16 MiB scoped VMEM


def _round_up(n, m):
    return ((n + m - 1) // m) * m


# ---------------------------------------------------------------------------
# Kernels
# ---------------------------------------------------------------------------

def _mlp_q(x, w1_ref, w23_ref, b_ref):
    """Whole MLP on one row tile; returns lane-dense [TB, 128] Q slab.
    Cols >= 27 are exactly zero by construction (zero-padded W3/b3)."""
    b1 = b_ref[0:1, :]             # [1, 128]
    b2 = b_ref[1:2, :]             # [1, 128] (cols 64: are zero)
    b3 = b_ref[2:3, :]             # [1, 128] (cols 27: are zero)
    h1 = jnp.maximum(jnp.dot(x, w1_ref[...],
                             preferred_element_type=jnp.float32) + b1, 0.0)
    h2 = jnp.maximum(jnp.dot(h1, w23_ref[0],
                             preferred_element_type=jnp.float32) + b2, 0.0)
    return jnp.dot(h2, w23_ref[1], preferred_element_type=jnp.float32) + b3


def dqn_kernel(x_ref, w1_ref, w23_ref, b_ref, out_ref):
    q = _mlp_q(x_ref[...], w1_ref, w23_ref, b_ref)      # [TB, 128] f32
    out_ref[...] = q.astype(out_ref.dtype)               # lane-dense store


def dqn_argmax_kernel(x_ref, w1_ref, w23_ref, b_ref, act_ref, qmax_ref):
    """Fused DQN consumer: per-row argmax/max over the 27 valid Q lanes."""
    q = _mlp_q(x_ref[...], w1_ref, w23_ref, b_ref)                 # [TB, 128]
    lane = jax.lax.broadcasted_iota(jnp.float32, q.shape, 1)
    qv = jnp.where(lane < ACTION_SIZE, q, -jnp.inf)
    best = jnp.max(qv, axis=-1, keepdims=True)                      # [TB, 1]
    idx = jnp.where(qv == best, lane, jnp.float32(LANE))
    act_ref[...] = jnp.min(idx, axis=-1, keepdims=True).astype(jnp.int32)
    qmax_ref[...] = best


# ---------------------------------------------------------------------------
# Wrappers
# ---------------------------------------------------------------------------

def _choose_tile(batch, block_rows):
    """Row tile + padded batch: multiple of 8, <= MAX_TILE_ROWS, >=2 grid steps
    whenever the batch allows (so v7x's two TensorCores both get work), and
    minimal batch padding."""
    block_rows = max(8, min(int(block_rows), MAX_TILE_ROWS))
    b8 = _round_up(max(batch, 1), 8)
    min_steps = 2 if b8 >= 16 else 1
    n_steps = max(min_steps, pl.cdiv(b8, block_rows))
    tb = min(_round_up(pl.cdiv(b8, n_steps), 8), block_rows)
    bpad = _round_up(b8, tb)
    return tb, bpad


def _pad_rows(x, bpad):
    batch = x.shape[0]
    if bpad != batch:
        x = jnp.pad(x, ((0, bpad - batch), (0, 0)))
    return x


def _in_specs(tb):
    return [
        pl.BlockSpec((tb, STATE_SIZE), lambda i: (i, 0)),       # x: blocked rows
        pl.BlockSpec((STATE_SIZE, H1), lambda i: (0, 0)),       # W1: resident
        pl.BlockSpec((2, LANE, LANE), lambda i: (0, 0, 0)),     # W2p/W3p: resident
        pl.BlockSpec((3, LANE), lambda i: (0, 0)),              # biases: resident
    ]


def dqn_forward(x, packed_params, *, block_rows=4096, out_dtype=jnp.float32,
                return_padded=False):
    """x: [B, STATE_SIZE] -> Q-values.

    return_padded=False (default): returns [B, ACTION_SIZE], matching the
      PyTorch forward exactly.
    return_padded=True: returns the lane-dense [Bpad, 128] slab (cols 27: are
      zero) so the consumer can slice lazily / fuse, skipping the slice copy.
    out_dtype=jnp.bfloat16 halves the dominant output HBM write (MXU still
    accumulates in f32; only the final store is cast).
    """
    w1, w23, biases = packed_params
    batch = x.shape[0]
    tb, bpad = _choose_tile(batch, block_rows)
    x = _pad_rows(x, bpad)

    out = pl.pallas_call(
        dqn_kernel,
        out_shape=jax.ShapeDtypeStruct((bpad, LANE), out_dtype),
        grid=(bpad // tb,),
        in_specs=_in_specs(tb),
        out_specs=pl.BlockSpec((tb, LANE), lambda i: (i, 0)),
        compiler_params=pltpu.CompilerParams(
            dimension_semantics=("parallel",),
        ),
    )(x, w1, w23, biases)

    if return_padded:
        return out
    return out[:batch, :ACTION_SIZE]


def dqn_select_action(x, packed_params, *, block_rows=4096):
    """Fused action-selection path: argmax over the 27 valid Q lanes inside the
    kernel. Returns (actions [B] int32, q_of_action [B] float32)."""
    w1, w23, biases = packed_params
    batch = x.shape[0]
    tb, bpad = _choose_tile(batch, block_rows)
    x = _pad_rows(x, bpad)

    act, qmax = pl.pallas_call(
        dqn_argmax_kernel,
        out_shape=(jax.ShapeDtypeStruct((bpad, 1), jnp.int32),
                   jax.ShapeDtypeStruct((bpad, 1), jnp.float32)),
        grid=(bpad // tb,),
        in_specs=_in_specs(tb),
        out_specs=(pl.BlockSpec((tb, 1), lambda i: (i, 0)),
                   pl.BlockSpec((tb, 1), lambda i: (i, 0))),
        compiler_params=pltpu.CompilerParams(
            dimension_semantics=("parallel",),
        ),
    )(x, w1, w23, biases)

    return act[:batch, 0], qmax[:batch, 0]


# ---------------------------------------------------------------------------
# Params
# ---------------------------------------------------------------------------

def init_params(key):
    """PyTorch nn.Linear default init: U(-1/sqrt(fan_in), 1/sqrt(fan_in)).
    Weights stored as [in, out] (transposed vs. PyTorch's [out, in])."""
    def linear(key, fan_in, fan_out):
        kw, kb = jax.random.split(key)
        bound = 1.0 / jnp.sqrt(jnp.float32(fan_in))
        w = jax.random.uniform(kw, (fan_in, fan_out), jnp.float32, -bound, bound)
        b = jax.random.uniform(kb, (fan_out,), jnp.float32, -bound, bound)
        return w, b

    k1, k2, k3 = jax.random.split(key, 3)
    w1, b1 = linear(k1, STATE_SIZE, H1)
    w2, b2 = linear(k2, H1, H2)
    w3, b3 = linear(k3, H2, ACTION_SIZE)
    return (w1, b1, w2, b2, w3, b3)


def pack_params(params):
    """Zero-pad W2/W3 to [128,128], stack them, pack biases into [3,128].
    NOTE: correctness relies on the padded regions staying exactly zero."""
    w1, b1, w2, b2, w3, b3 = params
    w2p = jnp.zeros((LANE, LANE), jnp.float32).at[:, :H2].set(w2)
    w3p = jnp.zeros((LANE, LANE), jnp.float32).at[:H2, :ACTION_SIZE].set(w3)
    w23 = jnp.stack([w2p, w3p], axis=0)                      # [2, 128, 128]
    bpack = jnp.zeros((3, LANE), jnp.float32)
    bpack = bpack.at[0, :H1].set(b1)
    bpack = bpack.at[1, :H2].set(b2)
    bpack = bpack.at[2, :ACTION_SIZE].set(b3)
    return (w1, w23, bpack)


if __name__ == "__main__":
    key = jax.random.PRNGKey(0)
    kp, kx = jax.random.split(key)

    params = init_params(kp)
    packed = pack_params(params)

    B = 16   # multiple of 8 -> no padding; 2 grid steps -> both v7x TCs used
    x = jax.random.normal(kx, (B, STATE_SIZE), jnp.float32)

    out = jax.block_until_ready(dqn_forward(x, packed))

    # Reference check in plain JAX (same math as the PyTorch forward).
    w1, b1, w2, b2, w3, b3 = params
    ref = jnp.maximum(x @ w1 + b1, 0.0)
    ref = jnp.maximum(ref @ w2 + b2, 0.0)
    ref = ref @ w3 + b3

    assert out.shape == (B, ACTION_SIZE)
    assert jnp.allclose(out, ref, atol=1e-5, rtol=1e-5)

    # Fused argmax (action-selection) path.
    act, qmax = jax.block_until_ready(dqn_select_action(x, packed))
    assert act.shape == (B,) and qmax.shape == (B,)
    assert jnp.array_equal(act, jnp.argmax(ref, axis=-1).astype(jnp.int32))
    assert jnp.allclose(qmax, jnp.max(ref, axis=-1), atol=1e-5, rtol=1e-5)

    print("KERNEL_OK")
</pallas_src>

<mosaic_0001>
module attributes {stable_mosaic.version = 11 : i64} {
  func.func @dqn_kernel(%arg0: i32, %arg1: memref<8x12xf32, #tpu.memory_space<vmem>>, %arg2: memref<12x128xf32, #tpu.memory_space<vmem>>, %arg3: memref<2x128x128xf32, #tpu.memory_space<vmem>>, %arg4: memref<3x128xf32, #tpu.memory_space<vmem>>, %arg5: memref<8x128xf32, #tpu.memory_space<vmem>>) attributes {dimension_semantics = [#tpu.dimension_semantics<parallel>], iteration_bounds = array<i64: 2>, scalar_prefetch = 0 : i64, scratch_operands = 0 : i64, tpu.core_type = #tpu.core_type<tc>, window_params = [{transform_indices = @transform_0, window_bounds = array<i64: 8, 12>}, {pipeline_mode = #tpu.pipeline_mode<synchronous>, transform_indices = @transform_1, window_bounds = array<i64: 12, 128>}, {pipeline_mode = #tpu.pipeline_mode<synchronous>, transform_indices = @transform_2, window_bounds = array<i64: 2, 128, 128>}, {pipeline_mode = #tpu.pipeline_mode<synchronous>, transform_indices = @transform_3, window_bounds = array<i64: 3, 128>}, {transform_indices = @transform_4, window_bounds = array<i64: 8, 128>}]} {
    %c0 = arith.constant 0 : index
    %c0_0 = arith.constant 0 : index
    %0 = vector.load %arg1[%c0, %c0_0] : memref<8x12xf32, #tpu.memory_space<vmem>>, vector<8x12xf32>
    %c0_1 = arith.constant 0 : index
    %c0_2 = arith.constant 0 : index
    %1 = vector.load %arg4[%c0_1, %c0_2] : memref<3x128xf32, #tpu.memory_space<vmem>>, vector<1x128xf32>
    %c1 = arith.constant 1 : index
    %c0_3 = arith.constant 0 : index
    %2 = vector.load %arg4[%c1, %c0_3] : memref<3x128xf32, #tpu.memory_space<vmem>>, vector<1x128xf32>
    %c2 = arith.constant 2 : index
    %c0_4 = arith.constant 0 : index
    %3 = vector.load %arg4[%c2, %c0_4] : memref<3x128xf32, #tpu.memory_space<vmem>>, vector<1x128xf32>
    %c0_5 = arith.constant 0 : index
    %c0_6 = arith.constant 0 : index
    %4 = vector.load %arg2[%c0_5, %c0_6] : memref<12x128xf32, #tpu.memory_space<vmem>>, vector<12x128xf32>
    %cst = arith.constant dense<0.000000e+00> : vector<8x128xf32>
    %5 = tpu.matmul %0, %4, %cst {dimension_numbers = #tpu.dot_dimension_numbers<[1], [0], [0], [1], [0, 0, 1, 1], [], []>} : vector<8x12xf32>, vector<12x128xf32>, vector<8x128xf32> -> vector<8x128xf32>
    %6 = vector.broadcast %1 : vector<1x128xf32> to vector<8x128xf32>
    %7 = arith.addf %5, %6 : vector<8x128xf32>
    %cst_7 = arith.constant 0.000000e+00 : f32
    %8 = vector.broadcast %cst_7 : f32 to vector<8x128xf32>
    %9 = arith.maximumf %7, %8 : vector<8x128xf32>
    %c0_8 = arith.constant 0 : index
    %c0_9 = arith.constant 0 : index
    %c0_10 = arith.constant 0 : index
    %10 = vector.load %arg3[%c0_8, %c0_9, %c0_10] : memref<2x128x128xf32, #tpu.memory_space<vmem>>, vector<1x128x128xf32>
    %11 = vector.shape_cast %10 : vector<1x128x128xf32> to vector<128x128xf32>
    %cst_11 = arith.constant dense<0.000000e+00> : vector<8x128xf32>
    %12 = tpu.matmul %9, %11, %cst_11 {dimension_numbers = #tpu.dot_dimension_numbers<[1], [0], [0], [1], [0, 0, 1, 1], [], []>} : vector<8x128xf32>, vector<128x128xf32>, vector<8x128xf32> -> vector<8x128xf32>
    %13 = vector.broadcast %2 : vector<1x128xf32> to vector<8x128xf32>
    %14 = arith.addf %12, %13 : vector<8x128xf32>
    %cst_12 = arith.constant 0.000000e+00 : f32
    %15 = vector.broadcast %cst_12 : f32 to vector<8x128xf32>
    %16 = arith.maximumf %14, %15 : vector<8x128xf32>
    %c1_13 = arith.constant 1 : index
    %c0_14 = arith.constant 0 : index
    %c0_15 = arith.constant 0 : index
    %17 = vector.load %arg3[%c1_13, %c0_14, %c0_15] : memref<2x128x128xf32, #tpu.memory_space<vmem>>, vector<1x128x128xf32>
    %18 = vector.shape_cast %17 : vector<1x128x128xf32> to vector<128x128xf32>
    %cst_16 = arith.constant dense<0.000000e+00> : vector<8x128xf32>
    %19 = tpu.matmul %16, %18, %cst_16 {dimension_numbers = #tpu.dot_dimension_numbers<[1], [0], [0], [1], [0, 0, 1, 1], [], []>} : vector<8x128xf32>, vector<128x128xf32>, vector<8x128xf32> -> vector<8x128xf32>
    %20 = vector.broadcast %3 : vector<1x128xf32> to vector<8x128xf32>
    %21 = arith.addf %19, %20 : vector<8x128xf32>
    %c0_17 = arith.constant 0 : index
    %c0_18 = arith.constant 0 : index
    %22 = vector.load %arg5[%c0_17, %c0_18] : memref<8x128xf32, #tpu.memory_space<vmem>>, vector<8x128xf32>
    tpu.vector_store %arg5[%c0_17, %c0_18], %21 {strides = array<i32>} : memref<8x128xf32, #tpu.memory_space<vmem>>, vector<8x128xf32>,
    return
  }
  func.func @transform_0(%arg0: i32) -> (i32, i32) {
    %c0_i32 = arith.constant 0 : i32
    %c0_i32_0 = arith.constant 0 : i32
    return %arg0, %c0_i32 : i32, i32
  }
  func.func @transform_1(%arg0: i32) -> (i32, i32) {
    %c0_i32 = arith.constant 0 : i32
    %c0_i32_0 = arith.constant 0 : i32
    %c0_i32_1 = arith.constant 0 : i32
    return %c0_i32, %c0_i32_0 : i32, i32
  }
  func.func @transform_2(%arg0: i32) -> (i32, i32, i32) {
    %c0_i32 = arith.constant 0 : i32
    %c0_i32_0 = arith.constant 0 : i32
    %c0_i32_1 = arith.constant 0 : i32
    %c0_i32_2 = arith.constant 0 : i32
    return %c0_i32, %c0_i32_0, %c0_i32_1 : i32, i32, i32
  }
  func.func @transform_3(%arg0: i32) -> (i32, i32) {
    %c0_i32 = arith.constant 0 : i32
    %c0_i32_0 = arith.constant 0 : i32
    %c0_i32_1 = arith.constant 0 : i32
    return %c0_i32, %c0_i32_0 : i32, i32
  }
  func.func @transform_4(%arg0: i32) -> (i32, i32) {
    %c0_i32 = arith.constant 0 : i32
    %c0_i32_0 = arith.constant 0 : i32
    return %arg0, %c0_i32 : i32, i32
  }
}

</mosaic_0001>

<bundles_post_ra>
// kernel: tpu_custom_call.1
= control target key start
LH: loop header
LB: loop body
LE: loop exit
PB: predicated region body
PF: predicated region fallthrough
CT: control target
= control target key end

     0   :  { %9 = vsyncpa [#allocation3], 0  ;;  %s1332_s0 = inlined_call_operand.hbm [shape: f32[16,12], index: 0, kind: input, shape index: {}]   ;;  %s1333_s1 = inlined_call_operand.hbm [shape: f32[12,128], index: 1, kind: input, shape index: {}]   ;;  %s1334_s2 = inlined_call_operand.hbm [shape: f32[2,128,128], index: 2, kind: input, shape index: {}]   ;;  %s1335_s3 = inlined_call_operand.vmem [shape: f32[3,128], index: 3, kind: input, shape index: {}]   ;;  %s1336_s4 = inlined_call_operand.hbm [shape: f32[16,128], index: 4, kind: output, shape index: {}]  }
   0x1   :  { %11 = vsyncpa [#allocation3 + $0x1], 0 }
   0x2   :  { %12 = vsyncpa [#allocation6], 0 }
   0x3   :  { %13 = vsyncpa [#allocation4], 0 }
   0x4   :  { %15 = vsyncpa [#allocation4 + $0x1], 0  ;;  %s1070_s15 = smov 0   ;;  %s1072_s16 = smov 0  }
   0x5   :  { %s1074_s17 = smov 0   ;;  %s1076_s18 = smov 0  }
   0x6 LB: > { %s1091_s19 = sadd.s32 4294967295, %s1033_s18   ;;  %s617_s20 = sadd.s32 4294967294, %s1033_s18   ;;  %s1033_s18 = sphi %s1076_s18, %s1356_s18   ;;  %s1029_s17 = sphi %s1074_s17, %s1355_s17   ;;  %s1025_s16 = sphi %s1072_s16, %s1354_s16   ;;  %s1021_s15 = sphi %s1070_s15, %s1353_s15  }
   0x7   : > { %p41_p0 = scmp.ne.s32.totalorder %s1025_s16, %s1021_s15  ;;  %p1337_p1 = scmp.eq.s32.totalorder %s1091_s19, 0 }
   0x8   : > { %p134_p3 = scmp.eq.s32.totalorder %s617_s20, 1  ;;  %p618_p5 = scmp.ge.s32.totalorder %s1033_s18, 1 }
   0x9   : > { %p1100_p4 = por %p1337_p1, %p41_p0  ;;  %p141_p7 = scmp.lt.s32.totalorder %s1033_s18, 3 }
   0xa   : > { %p1105_p6 = por %p134_p3, %p41_p0  ;;  %s1035_s24 = smov [#allocation5]  }
   0xb   : > { %s1340_s21 = scalar_select %p1100_p4, 1, 0 }
   0xc   : > { %s1341_s22 = scalar_select %p1105_p6, 1, 0 }
   0xd   : > { %p1110_p8 = pnand %p618_p5, %p141_p7  ;;  %s153_s25 = sshll.u32 %s1035_s24, 4  ;;  %s1114_s25 = int_to_ptr.vmem [resolvable:$true] %s153_s25 }
   0xe   : > { %s1036_s27 = smov [#allocation7]   ;;  %s877_s5 = scalar_lea.hbm %s1333_s1, 256 }
   0xf   : > { %p816_p9 = pneg %p1110_p8  ;;  %s166_s28 = sshll.u32 %s1036_s27, 4  ;;  %s1125_s28 = int_to_ptr.vmem [resolvable:$true] %s166_s28 }
  0x10   : > { %p878_p12 = scmp.ne.s32.totalorder %s1333_s1, %s877_s5  ;;  %p884_p5 = scmp.lt.u32.totalorder %s877_s5, %s1333_s1 }
  0x11   : > { %p1121_p11 = pnand %p816_p9, %p1337_p1 }
  0x13   : > { %p879_p13 = pneg %p1121_p11 }
  0x15   : > { %p880_p0 = pnand %p879_p13, %p878_p12 }
  0x17   : > { %p881_p3 = pneg %p880_p0 }
  0x19   : > { %p886_p7 = pnand %p884_p5, %p881_p3 }
  0x1b   : > { %889 = shalt.err (!%p886_p7)
}
  0x1c   : > { %s890_s10 = scalar_lea.vmem %s1114_s25, 256  ;;  %p898_p2 = scmp.lt.s32.totalorder %s1114_s25, %s1114_s25 }
  0x1d   : > { %p891_p9 = scmp.ne.s32.totalorder %s1114_s25, %s890_s10  ;;  %p899_p12 = scmp.lt.s32.totalorder %s890_s10, %s890_s10 }
  0x1f   : > { %p893_p10 = pnand %p891_p9, %p879_p13  ;;  %p900_p0 = por %p899_p12, %p898_p2 }
  0x21   : > { %p894_p1 = pneg %p893_p10 }
  0x23   : > { %p901_p6 = pnand %p900_p0, %p894_p1 }
  0x25   : > { %904 = shalt.err (!%p901_p6)
}
  0x26   : > { %s1037_s11 = smov 128   ;;  %s1038_s12 = smov 8  }
  0x27   : > { %819 = dma.hbm_to_vmem [thread:$0]  (!%p1121_p11), %s1333_s1, 256, %s1114_s25, [#allocation6], %s1037_s11, %s1037_s11, %s1038_s12  }
  0x28   : > { %s905_s27 = scalar_lea.hbm %s1334_s2, 4096 }
  0x29   : > { %p906_p2 = scmp.ne.s32.totalorder %s1334_s2, %s905_s27  ;;  %p912_p10 = scmp.lt.u32.totalorder %s905_s27, %s1334_s2 }
  0x2b   : > { %p908_p1 = pnand %p906_p2, %p879_p13 }
  0x2d   : > { %p909_p6 = pneg %p908_p1 }
  0x2f   : > { %p914_p3 = pnand %p912_p10, %p909_p6 }
  0x31   : > { %917 = shalt.err (!%p914_p3)
}
  0x32   : > { %s918_s25 = scalar_lea.vmem %s1125_s28, 4096  ;;  %p926_p12 = scmp.lt.s32.totalorder %s1125_s28, %s1125_s28 }
  0x33   : > { %p919_p5 = scmp.ne.s32.totalorder %s1125_s28, %s918_s25  ;;  %p927_p0 = scmp.lt.s32.totalorder %s918_s25, %s918_s25 }
  0x35   : > { %p921_p7 = pnand %p919_p5, %p879_p13  ;;  %p928_p2 = por %p927_p0, %p926_p12 }
  0x37   : > { %p922_p9 = pneg %p921_p7 }
  0x39   : > { %p929_p1 = pnand %p928_p2, %p922_p9 }
  0x3b   : > { %932 = shalt.err (!%p929_p1)
}
  0x3c   : > { %822 = dma.hbm_to_vmem [thread:$0]  (!%p1121_p11), %s1334_s2, 4096, %s1125_s28, [#allocation6], %s1037_s11, %s1037_s11, %s1038_s12  }
  0x3d   : > { %s1180_s9 = sadd.s32 1, %s1033_s18   ;;  %s28_s26 = sadd.s32 1, %s1029_s17 }
  0x3e   : > { %s25_s10 = ssub.s32 %s1033_s18, %s1180_s9  ;;  %p35_p13 = scmp.ne.s32.totalorder %s1029_s17, %s1025_s16 }
  0x3f   : > { %p26_p6 = scmp.eq.s32.totalorder %s25_s10, 0  ;;  %p36_p10 = scmp.eq.s32.totalorder %s1033_s18, 0 }
  0x40   : > { %p1344_p3 = scmp.eq.s32.totalorder %s1091_s19, 1  ;;  %p833_p7 = scmp.lt.s32.totalorder %s1033_s18, 2 }
  0x41   : > { %s1196_s14 = scalar_select %p26_p6, %s1029_s17, %s28_s26  }
  0x42   : > { %p1190_p5 = por %p1344_p3, %p35_p13  ;;  %p37_p9 = por %p36_p10, %p35_p13 }
  0x43   : > { %s183_s20 = sand.u32 1, %s1029_s17   ;;  %s623_s28 = sshll.u32 %s1033_s18, 7 }
  0x44   : > { %s1345_s13 = scalar_select %p1190_p5, 1, 0 }
  0x45   : > { %s622_s24 = sshll.u32 %s183_s20, 3  ;;  %s1203_s27 = scalar_lea.hbm %s1332_s0, %s623_s28 }
  0x46   : > { %s187_s29 = scalar_lea.vmem [#allocation2], %s622_s24  ;;  %p1207_p11 = pnand %p833_p7, %p37_p9 }
  0x47   : > { %s194_s30 = sshll.u32 %s187_s29, 4  ;;  %s184_s6 = scalar_lea.sflag [#allocation3], %s183_s20  ;;  %s1205_s30 = int_to_ptr.vmem [resolvable:$true] %s194_s30 }
  0x48   : > { %s933_s25 = scalar_lea.hbm %s1203_s27, 128  ;;  %p935_p0 = pneg %p1207_p11 }
  0x49   : > { %p934_p12 = scmp.ne.s32.totalorder %s1203_s27, %s933_s25  ;;  %s938_s26 = scalar_lea.hbm %s1332_s0, 256 }
  0x4a   : > { %p939_p13 = scmp.lt.u32.totalorder %s1203_s27, %s1332_s0  ;;  %p940_p6 = scmp.lt.u32.totalorder %s938_s26, %s933_s25 }
  0x4b   : > { %p936_p2 = pnand %p935_p0, %p934_p12  ;;  %p942_p3 = scmp.lt.u32.totalorder %s933_s25, %s1203_s27 }
  0x4c   : > { %p941_p10 = por %p940_p6, %p939_p13 }
  0x4d   : > { %p937_p1 = pneg %p936_p2 }
  0x4e   : > { %p943_p7 = por %p942_p3, %p941_p10 }
  0x50   : > { %p944_p9 = pnand %p943_p7, %p937_p1 }
  0x52   : > { %947 = shalt.err (!%p944_p9)
}
  0x53   : > { %s948_s20 = scalar_lea.vmem %s1205_s30, 128  ;;  %s1039_s28 = smov [#allocation2]  }
  0x54   : > { %p949_p12 = scmp.ne.s32.totalorder %s1205_s30, %s948_s20  ;;  %s953_s11 = sshll.u32 %s1039_s28, 4  ;;  %s954_s11 = int_to_ptr.vmem [resolvable:$false] %s953_s11 }
  0x55   : > { %s955_s12 = scalar_lea.vmem %s954_s11, 256  ;;  %p956_p4 = scmp.lt.s32.totalorder %s1205_s30, %s954_s11 }
  0x56   : > { %p951_p2 = pnand %p949_p12, %p935_p0  ;;  %p957_p13 = scmp.lt.s32.totalorder %s955_s12, %s948_s20 }
  0x58   : > { %p952_p5 = pneg %p951_p2  ;;  %p958_p6 = por %p957_p13, %p956_p4 }
  0x5a   : > { %p959_p10 = pnand %p958_p6, %p952_p5 }
  0x5c   : > { %962 = shalt.err (!%p959_p10)
}
  0x5d   : > { %826 = dma.hbm_to_vmem [thread:$0]  (!%p1207_p11), %s1203_s27, 128, %s1205_s30, %s184_s6  }
  0x5e   : > { %203 = sbr.rel (%p1110_p8) target bundleno = 772 (0x304), region = 36  ;;  %s1239_s29 = sand.u32 (!%p1110_p8), 1, %s1025_s16  }
  0x5f   : > { %s625_s25 = sshll.u32 (!%p1110_p8), %s1239_s29, 3  ;;  %s206_s7 = scalar_lea.sflag (!%p1110_p8), [#allocation3], %s1239_s29 }
  0x60   : > { %s209_s8 = scalar_lea.vmem (!%p1110_p8), [#allocation2], %s625_s25  ;;  %p1347_p4 = scmp.ne.s32.totalorder (!%p1110_p8), %s1340_s21, 0 }
  0x65   : > { %1008 = dma.done.wait (%p1347_p4), %s206_s7, 128  }
  0x66   : > { %1010 = vsyncadd (%p1347_p4), %s206_s7, 4294967168  ;;  %p1348_p5 = scmp.eq.s32.totalorder %s1091_s19, 0 }
  0x68   : > { %1012 = dma.done.wait (%p1348_p5), [#allocation6], 4352   ;;  %p1349_p8 = pmov %p1348_p5 }
  0x69   : > { %v1040_v0 = vmov 0.0|0.0   ;;  %vm1041_vm0 = vmmov 0   ;;  %v1042_v1 = vmov 0.0   ;;  %vm256_vm1 = vcmask 1043456   ;;  %v246_v2 = vld [vmem:[#allocation5] sm:$0xff]  ;;  %v331_v5 = vld [vmem:[#allocation7] sm:$0xff] }
  0x6a   : > { %1014 = vsyncadd (%p1349_p8), [#allocation6], 4294962944  ;;  %752 = vmatprep.subr.bf16.mxu0 %v1040_v0  ;;  %756 = vmatprep.subr.bf16.mxu1 %v1040_v0  ;;  %v247_v3 = vld [vmem:[#allocation5 + $0x8] sm:$0xf]  ;;  %vm1043_vm2 = vmmov 1   ;;  %v332_v6 = vld [vmem:[#allocation7 + $0x8] sm:$0xff] }
  0x6b   : > { %679 = vmatprep.mubr.msk.f32.mxu0 %vm1041_vm0, %v1042_v1  ;;  %714 = vmatprep.mubr.msk.f32.mxu1 %vm1041_vm0, %v1042_v1  ;;  %vm754_vm3 = vmpackc.low %vm256_vm1, %vm1043_vm2  ;;  %v753_v4 = vpack.c.bf16 %v247_v3, %v246_v2  ;;  %v333_v7 = vld [vmem:[#allocation7 + $0x10] sm:$0xff]  ;;  %v757_v8 = vpack.c.bf16 %v332_v6, %v331_v5  ;;  %v334_v9 = vld [vmem:[#allocation7 + $0x18] sm:$0xff]  ;;  %vm252_vm4 = vcmask 97280   ;;  %s635_s26 = sshll.u32 %s1091_s19, 7  ;;  %s241_s10 = scalar_lea.vmem [#allocation8], %s625_s25 }
  0x6c   : > { %v242_v10 = vld [vmem:[%s209_s8] sm:$0xff]  ;;  %v760_v11 = vpack.c.bf16 %v334_v9, %v333_v7  ;;  %v337_v15 = vld [vmem:[#allocation7 + $0x30] sm:$0xff]  ;;  %v338_v16 = vld [vmem:[#allocation7 + $0x38] sm:$0xff]  ;;  %s528_s24 = sshll.u32 %s241_s10, 4  ;;  %s1288_s11 = scalar_lea.hbm %s1336_s4, %s635_s26  ;;  %s1290_s24 = int_to_ptr.vmem [resolvable:$true] %s528_s24 }
  0x6d   : > { %755 = vmatpush3.bf16.msk.msra.mxu0 %vm754_vm3, %v753_v4  ;;  %758 = vmatpush3.bf16.msra.mxu1 %v757_v8  ;;  %v335_v12 = vld [vmem:[#allocation7 + $0x20] sm:$0xff]  ;;  %v336_v13 = vld [vmem:[#allocation7 + $0x28] sm:$0xff]  ;;  %v766_v17 = vpack.c.bf16 %v338_v16, %v337_v15  ;;  %v341_v21 = vld [vmem:[#allocation7 + $0x50] sm:$0xff]  ;;  %s515_s12 = scalar_lea.sflag [#allocation4], %s1239_s29  ;;  %s963_s7 = scalar_lea.vmem %s1290_s24, 128 }
  0x6e   : > { %780 = vmatprep.subr.bf16.mxu0 %v1040_v0  ;;  %759 = vmatprep.subr.bf16.mxu1 %v1040_v0  ;;  %v763_v14 = vpack.c.bf16 %v336_v13, %v335_v12  ;;  %v339_v18 = vld [vmem:[#allocation7 + $0x40] sm:$0xff]  ;;  %v340_v19 = vld [vmem:[#allocation7 + $0x48] sm:$0xff]  ;;  %v342_v22 = vld [vmem:[#allocation7 + $0x58] sm:$0xff]  ;;  %p964_p11 = scmp.ne.s32.totalorder %s1290_s24, %s963_s7  ;;  %p1350_p0 = scmp.ne.s32.totalorder %s1345_s13, 0 }
  0x6f   : > { %v769_v20 = vpack.c.bf16 %v340_v19, %v339_v18  ;;  %v772_v23 = vpack.c.bf16 %v342_v22, %v341_v21  ;;  %v343_v24 = vld [vmem:[#allocation7 + $0x60] sm:$0xff]  ;;  %v344_v25 = vld [vmem:[#allocation7 + $0x68] sm:$0xff]  ;;  %v345_v27 = vld [vmem:[#allocation7 + $0x70] sm:$0xff]  ;;  %s1044_s19 = smov [#allocation8]  }
  0x70   : > { %680 = vmatmul.mubr.msk.f32.vlgmr.msra.gmra.mrb[0].mxu0 %vm252_vm4, %v242_v10  ;;  %v775_v26 = vpack.c.bf16 %v344_v25, %v343_v24  ;;  %v346_v28 = vld [vmem:[#allocation7 + $0x78] sm:$0xff]  ;;  %v423_v30 = vld [vmem:[#allocation7 + $0x80] sm:$0xff]  ;;  %v424_v31 = vld [vmem:[#allocation7 + $0x88] sm:$0xff]  ;;  %p965_p1 = pnand %p964_p11, %p1350_p0  ;;  %s967_s25 = sshll.u32 %s1044_s19, 4  ;;  %s968_s25 = int_to_ptr.vmem [resolvable:$false] %s967_s25 }
  0x71   : > { %749 = vmatprep.mubr.msk.f32.mxu0 %vm1041_vm0, %v1042_v1  ;;  %761 = vmatpush3.bf16.msra.mxu1 %v760_v11  ;;  %v778_v29 = vpack.c.bf16 %v346_v28, %v345_v27  ;;  %v425_v32 = vld [vmem:[#allocation7 + $0x90] sm:$0xff]  ;;  %v781_v33 = vpack.c.bf16 %v424_v31, %v423_v30  ;;  %v426_v34 = vld [vmem:[#allocation7 + $0x98] sm:$0xff]  ;;  %v427_v36 = vld [vmem:[#allocation7 + $0xa0] sm:$0xff]  ;;  %s969_s8 = scalar_lea.vmem %s968_s25, 256  ;;  %p970_p7 = scmp.lt.s32.totalorder %s1290_s24, %s968_s25 }
  0x72   : > { %762 = vmatprep.subr.bf16.mxu1 %v1040_v0  ;;  %v784_v35 = vpack.c.bf16 %v426_v34, %v425_v32  ;;  %v428_v37 = vld [vmem:[#allocation7 + $0xa8] sm:$0xff]  ;;  %v429_v39 = vld [vmem:[#allocation7 + $0xb0] sm:$0xff]  ;;  %v430_v40 = vld [vmem:[#allocation7 + $0xb8] sm:$0xff]  ;;  %p966_p3 = pneg %p965_p1  ;;  %p971_p9 = scmp.lt.s32.totalorder %s969_s8, %s963_s7 }
  0x73   : > { %782 = vmatpush3.bf16.msra.mxu0 %v781_v33  ;;  %v787_v38 = vpack.c.bf16 %v428_v37, %v427_v36  ;;  %v790_v41 = vpack.c.bf16 %v430_v40, %v429_v39  ;;  %v431_v42 = vld [vmem:[#allocation7 + $0xc0] sm:$0xff]  ;;  %v432_v43 = vld [vmem:[#allocation7 + $0xc8] sm:$0xff]  ;;  %v433_v45 = vld [vmem:[#allocation7 + $0xd0] sm:$0xff] }
  0x74   : > { %783 = vmatprep.subr.bf16.mxu0 %v1040_v0  ;;  %v793_v44 = vpack.c.bf16 %v432_v43, %v431_v42  ;;  %v434_v46 = vld [vmem:[#allocation7 + $0xd8] sm:$0xff]  ;;  %v435_v48 = vld [vmem:[#allocation7 + $0xe0] sm:$0xff]  ;;  %v436_v49 = vld [vmem:[#allocation7 + $0xe8] sm:$0xff]  ;;  %p972_p12 = por %p971_p9, %p970_p7 }
  0x75   : > { %764 = vmatpush3.bf16.msra.mxu1 %v763_v14  ;;  %v796_v47 = vpack.c.bf16 %v434_v46, %v433_v45  ;;  %v799_v50 = vpack.c.bf16 %v436_v49, %v435_v48  ;;  %v629_v51 = vld [vmem:[%s1335_s3] ss:$0 sm:$0xff]  ;;  %v437_v56 = vld [vmem:[#allocation7 + $0xf0] sm:$0xff]  ;;  %v438_v57 = vld [vmem:[#allocation7 + $0xf8] sm:$0xff] }
  0x76   : > { %765 = vmatprep.subr.bf16.mxu1 %v1040_v0  ;;  %v802_v58 = vpack.c.bf16 %v438_v57, %v437_v56  ;;  %v632_v59 = vld [vmem:[%s1335_s3 + $0x1] ss:$0 sm:$0xff]  ;;  %p973_p2 = pnand %p972_p12, %p966_p3 }
  0x77   : > { %785 = vmatpush3.bf16.msra.mxu0 %v784_v35 }
  0x78   : > { %786 = vmatprep.subr.bf16.mxu0 %v1040_v0 }
  0x79   : > { %767 = vmatpush3.bf16.msra.mxu1 %v766_v17 }
  0x7a   : > { %768 = vmatprep.subr.bf16.mxu1 %v1040_v0 }
  0x7b   : > { %788 = vmatpush3.bf16.msra.mxu0 %v787_v38 }
  0x7c   : > { %789 = vmatprep.subr.bf16.mxu0 %v1040_v0 }
  0x7d   : > { %770 = vmatpush3.bf16.msra.mxu1 %v769_v20 }
  0x7e   : > { %771 = vmatprep.subr.bf16.mxu1 %v1040_v0 }
  0x7f   : > { %791 = vmatpush3.bf16.msra.mxu0 %v790_v41 }
  0x80   : > { %792 = vmatprep.subr.bf16.mxu0 %v1040_v0 }
  0x81   : > { %773 = vmatpush3.bf16.msra.mxu1 %v772_v23 }
  0x82   : > { %774 = vmatprep.subr.bf16.mxu1 %v1040_v0 }
  0x83   : > { %794 = vmatpush3.bf16.msra.mxu0 %v793_v44 }
  0x84   : > { %795 = vmatprep.subr.bf16.mxu0 %v1040_v0 }
  0x85   : > { %776 = vmatpush3.bf16.msra.mxu1 %v775_v26 }
  0x86   : > { %777 = vmatprep.subr.bf16.mxu1 %v1040_v0 }
  0x87   : > { %797 = vmatpush3.bf16.msra.mxu0 %v796_v47 }
  0x88   : > { %798 = vmatprep.subr.bf16.mxu0 %v1040_v0 }
  0x89   : > { %779 = vmatpush3.bf16.msra.mxu1 %v778_v29 }
  0x8b   : > { %800 = vmatpush3.bf16.msra.mxu0 %v799_v50 }
  0x8c   : > { %801 = vmatprep.subr.bf16.mxu0 %v1040_v0  ;;  %v633_v0 = vld [vmem:[%s1335_s3 + $0x2] ss:$0 sm:$0xff] }
  0x8f   : > { %803 = vmatpush3.bf16.msra.mxu0 %v802_v58 }
 0x143   : > { %v326_v52 = vpop.f32.mrb[0].mxu0 }
 0x144   : > { %v327_v53 = vadd.f32 %v629_v51, %v326_v52  ;;  %v681_v54 = vpop.f32.mrb[1].mxu0 }
 0x146   : > { %v330_v55 = vmax.f32 %v327_v53, 0.0 }
 0x148   : > { %715 = vmatmul.mubr.f32.vlgmr.msra.gmra.mrb[0].mxu1 %v330_v55 }
 0x21b   : > { %v417_v60 = vpop.f32.mrb[0].mxu1 }
 0x21c   : > { %v418_v61 = vadd.f32 %v632_v59, %v417_v60  ;;  %v716_v62 = vpop.f32.mrb[1].mxu1 }
 0x21e   : > { %v421_v63 = vmax.f32 %v418_v61, 0.0 }
 0x220   : > { %750 = vmatmul.mubr.f32.vlgmr.msra.gmra.mrb[2].mxu0 %v421_v63 }
 0x2f3   : > { %v509_v1 = vpop.f32.mrb[2].mxu0 }
 0x2f4   : > { %v510_v2 = vadd.f32 %v633_v0, %v509_v1  ;;  %v751_v3 = vpop.f32.mrb[3].mxu0 }
 0x2f6   : > { %513 = vst [vmem:[%s241_s10] sm:$0xff] %v510_v2 }
 0x2f7   : > { %976 = shalt.err (!%p973_p2)
}
 0x2f8   : > { %s977_s29 = scalar_lea.hbm %s1288_s11, 128  ;;  %s981_s27 = scalar_lea.hbm %s1336_s4, 256 }
 0x2f9   : > { %p978_p13 = scmp.ne.s32.totalorder %s1288_s11, %s977_s29  ;;  %p982_p4 = scmp.lt.u32.totalorder %s1288_s11, %s1336_s4 }
 0x2fa   : > { %p983_p5 = scmp.lt.u32.totalorder %s981_s27, %s977_s29  ;;  %p985_p11 = scmp.lt.u32.totalorder %s977_s29, %s1288_s11 }
 0x2fb   : > { %p979_p6 = pnand %p978_p13, %p1350_p0 }
 0x2fc   : > { %p984_p8 = por %p983_p5, %p982_p4 }
 0x2fd   : > { %p980_p10 = pneg %p979_p6 }
 0x2fe   : > { %p986_p1 = por %p985_p11, %p984_p8 }
 0x300   : > { %p987_p3 = pnand %p986_p1, %p980_p10 }
 0x302   : > { %990 = shalt.err (!%p987_p3)
}
 0x303   : > { %814 = dma.vmem_to_hbm [thread:$0]  (%p1350_p0), %s1290_s24, 128, %s1288_s11, %s515_s12  }
 0x304 PF: > { %s540_s6 = sand.u32 1, %s1021_s15   ;;  %p1351_p7 = scmp.ne.s32.totalorder %s1341_s22, 0 }
 0x305   : > { %p1352_p9 = scmp.ge.s32.totalorder %s1033_s18, 2  ;;  %s541_s26 = scalar_lea.sflag [#allocation4], %s540_s6 }
 0x307   : > { %p828_p12 = pnand %p1352_p9, %p1351_p7 }
 0x309   : > { %1016 = dma.done.wait (!%p828_p12), %s541_s26, 128  }
 0x30a   : > { %1018 = vsyncadd (!%p828_p12), %s541_s26, 4294967168  ;;  %p18_p2 = scmp.ge.s32.totalorder %s1180_s9, 4   ;;  %s1353_s15 = smov %s1025_s16 }
 0x30b   : > { %s1354_s16 = smov %s1029_s17  ;;  %s1355_s17 = smov %s1196_s14 }
 0x30c   : > { %s1356_s18 = smov %s1180_s9  ;;  %20 = sbr.rel (!%p18_p2) target bundleno = 6 (0x6), region = 90 }
 0x313   :  { %546 = vsyncpa [#allocation3], 1 }
 0x314   :  { %548 = vsyncpa [#allocation3 + $0x1], 1 }
 0x315   :  { %549 = vsyncpa [#allocation6], 1 }
 0x316   :  { %550 = vsyncpa [#allocation4], 1 }
 0x317   :  { %552 = vsyncpa [#allocation4 + $0x1], 1 }

</bundles_post_ra>
